<compile_context>
chip_gen: v6e
topology: v6e:2x2x1
jax: 0.10.0
libtpu: 0.0.40
codegen_flags: <defaults>
</compile_context>

<pallas_src>
import functools
import math

import jax
import jax.numpy as jnp
from jax.experimental import pallas as pl
from jax.experimental.pallas import tpu as pltpu

NEG_INF = -1e9
LN_EPS = 1e-5
VMEM_LIMIT = 48 * 1024 * 1024


def _cp(*sems):
    return pltpu.CompilerParams(dimension_semantics=sems,
                                vmem_limit_bytes=VMEM_LIMIT)


# ---------------------------------------------------------------------------
# Tiling helpers
# ---------------------------------------------------------------------------

def _row_block(n):
    for r in (512, 256, 128, 64, 32, 16, 8):
        if n % r == 0:
            return r
    return n


def _col_block(m):
    for r in (1024, 512, 256, 128):
        if m % r == 0:
            return r
    return m


def _f_block(f):
    for r in (1024, 512, 384, 256, 128):
        if f % r == 0:
            return r
    return f


# ---------------------------------------------------------------------------
# Row-tiled dense kernels (bf16 MXU, f32 accumulation)
# ---------------------------------------------------------------------------

def _linear_kernel(x_ref, w_ref, b_ref, o_ref):
    acc = jnp.dot(x_ref[...].astype(jnp.bfloat16), w_ref[...],
                  preferred_element_type=jnp.float32)
    o_ref[...] = (acc + b_ref[...]).astype(o_ref.dtype)


def linear_rows(x2d, w, b, out_dtype):
    # x2d: (N, In) f32/bf16, w: (In, Out) bf16, b: (Out,) f32
    n, k = x2d.shape
    m = w.shape[1]
    tm = _row_block(n)
    tn = _col_block(m)
    return pl.pallas_call(
        _linear_kernel,
        out_shape=jax.ShapeDtypeStruct((n, m), out_dtype),
        grid=(n // tm, m // tn),
        in_specs=[pl.BlockSpec((tm, k), lambda i, j: (i, 0)),
                  pl.BlockSpec((k, tn), lambda i, j: (0, j)),
                  pl.BlockSpec((1, tn), lambda i, j: (0, j))],
        out_specs=pl.BlockSpec((tm, tn), lambda i, j: (i, j)),
        compiler_params=_cp("parallel", "parallel"),
    )(x2d, w, b.reshape(1, m))


def _ln_kernel(x_ref, g_ref, b_ref, o_ref):
    x = x_ref[...].astype(jnp.float32)
    mu = jnp.mean(x, axis=-1, keepdims=True)
    var = jnp.mean((x - mu) ** 2, axis=-1, keepdims=True)
    y = (x - mu) * jax.lax.rsqrt(var + LN_EPS)
    o_ref[...] = (y * g_ref[...] + b_ref[...]).astype(o_ref.dtype)


def layer_norm_rows(x2d, g, b):
    n, e = x2d.shape
    tm = _row_block(n)
    return pl.pallas_call(
        _ln_kernel,
        out_shape=jax.ShapeDtypeStruct((n, e), x2d.dtype),
        grid=(n // tm,),
        in_specs=[pl.BlockSpec((tm, e), lambda i: (i, 0)),
                  pl.BlockSpec((1, e), lambda i: (0, 0)),
                  pl.BlockSpec((1, e), lambda i: (0, 0))],
        out_specs=pl.BlockSpec((tm, e), lambda i: (i, 0)),
        compiler_params=_cp("parallel"),
    )(x2d, g.reshape(1, e), b.reshape(1, e))


def _proj_add_ln_kernel(x_ref, w_ref, b_ref, res_ref, g_ref, beta_ref, o_ref,
                        *, apply_ln):
    # y = x @ W + b + residual ; optionally LayerNorm(y) (post-norm epilogue)
    y = jnp.dot(x_ref[...].astype(jnp.bfloat16), w_ref[...],
                preferred_element_type=jnp.float32)
    y = y + b_ref[...] + res_ref[...].astype(jnp.float32)
    if apply_ln:
        mu = jnp.mean(y, axis=-1, keepdims=True)
        var = jnp.mean((y - mu) ** 2, axis=-1, keepdims=True)
        y = (y - mu) * jax.lax.rsqrt(var + LN_EPS) * g_ref[...] + beta_ref[...]
    o_ref[...] = y.astype(o_ref.dtype)


def proj_add_ln(x2d, w, b, res2d, g, beta, *, apply_ln):
    n, k = x2d.shape
    m = w.shape[1]
    tm = _row_block(n)
    kern = functools.partial(_proj_add_ln_kernel, apply_ln=apply_ln)
    return pl.pallas_call(
        kern,
        out_shape=jax.ShapeDtypeStruct((n, m), res2d.dtype),
        grid=(n // tm,),
        in_specs=[pl.BlockSpec((tm, k), lambda i: (i, 0)),
                  pl.BlockSpec((k, m), lambda i: (0, 0)),
                  pl.BlockSpec((1, m), lambda i: (0, 0)),
                  pl.BlockSpec((tm, m), lambda i: (i, 0)),
                  pl.BlockSpec((1, m), lambda i: (0, 0)),
                  pl.BlockSpec((1, m), lambda i: (0, 0))],
        out_specs=pl.BlockSpec((tm, m), lambda i: (i, 0)),
        compiler_params=_cp("parallel"),
    )(x2d, w, b.reshape(1, m), res2d, g.reshape(1, m), beta.reshape(1, m))


def _ffn_fused_kernel(x_ref, w1_ref, b1_ref, w2_ref, b2_ref, res_ref,
                      g_ref, beta_ref, o_ref, acc_ref, *, apply_ln):
    # hidden-dim-tiled:  acc += relu(x @ w1_blk + b1_blk) @ w2_blk
    @pl.when(pl.program_id(1) == 0)
    def _():
        acc_ref[...] = jnp.zeros_like(acc_ref)

    h = jnp.dot(x_ref[...].astype(jnp.bfloat16), w1_ref[...],
                preferred_element_type=jnp.float32)
    h = jnp.maximum(h + b1_ref[...], 0.0)
    acc_ref[...] += jnp.dot(h.astype(jnp.bfloat16), w2_ref[...],
                            preferred_element_type=jnp.float32)

    @pl.when(pl.program_id(1) == pl.num_programs(1) - 1)
    def _():
        y = acc_ref[...] + b2_ref[...] + res_ref[...].astype(jnp.float32)
        if apply_ln:
            mu = jnp.mean(y, axis=-1, keepdims=True)
            var = jnp.mean((y - mu) ** 2, axis=-1, keepdims=True)
            y = (y - mu) * jax.lax.rsqrt(var + LN_EPS) * g_ref[...] + beta_ref[...]
        o_ref[...] = y.astype(o_ref.dtype)


def ffn_add_ln(x2d, w1, b1, w2, b2, res2d, g, beta, *, apply_ln):
    n, e = x2d.shape
    f = w1.shape[1]
    tm = _row_block(n)
    tf = _f_block(f)
    kern = functools.partial(_ffn_fused_kernel, apply_ln=apply_ln)
    return pl.pallas_call(
        kern,
        out_shape=jax.ShapeDtypeStruct((n, e), res2d.dtype),
        grid=(n // tm, f // tf),
        in_specs=[pl.BlockSpec((tm, e), lambda i, j: (i, 0)),
                  pl.BlockSpec((e, tf), lambda i, j: (0, j)),
                  pl.BlockSpec((1, tf), lambda i, j: (0, j)),
                  pl.BlockSpec((tf, e), lambda i, j: (j, 0)),
                  pl.BlockSpec((1, e), lambda i, j: (0, 0)),
                  pl.BlockSpec((tm, e), lambda i, j: (i, 0)),
                  pl.BlockSpec((1, e), lambda i, j: (0, 0)),
                  pl.BlockSpec((1, e), lambda i, j: (0, 0))],
        out_specs=pl.BlockSpec((tm, e), lambda i, j: (i, 0)),
        scratch_shapes=[pltpu.VMEM((tm, e), jnp.float32)],
        compiler_params=_cp("parallel", "arbitrary"),
    )(x2d, w1, b1.reshape(1, f), w2, b2.reshape(1, e), res2d,
      g.reshape(1, e), beta.reshape(1, e))


# ---------------------------------------------------------------------------
# Attention kernels
#   grid = (batch, q-tile); heads are split in-kernel from lane-dense blocks;
#   context is written back as a lane-dense (1, tq, E) block.
# ---------------------------------------------------------------------------

def _self_attn_kernel(qkv_ref, amask_ref, kbias_ref, o_ref, *, num_heads, tq):
    e = o_ref.shape[-1]
    dh = e // num_heads
    q_start = pl.multiple_of(pl.program_id(1) * tq, tq)
    mask = amask_ref[...] + kbias_ref[0]                      # (tq, Tk) f32

    ctx_heads = []
    for hh in range(num_heads):                               # static unroll
        q_h = qkv_ref[0, pl.ds(q_start, tq), hh * dh:(hh + 1) * dh]      # (tq, dh) bf16
        k_h = qkv_ref[0, :, e + hh * dh:e + (hh + 1) * dh]               # (Tk, dh) bf16
        v_h = qkv_ref[0, :, 2 * e + hh * dh:2 * e + (hh + 1) * dh]       # (Tk, dh) bf16
        s = jax.lax.dot_general(q_h, k_h, (((1,), (1,)), ((), ())),
                                preferred_element_type=jnp.float32)      # (tq, Tk)
        s = s + mask
        m = jnp.max(s, axis=-1, keepdims=True)
        p = jnp.exp(s - m)
        w = p / jnp.sum(p, axis=-1, keepdims=True)            # exact softmax
        ctx_heads.append(jnp.dot(w.astype(jnp.bfloat16), v_h,
                                 preferred_element_type=jnp.float32))    # (tq, dh)
    o_ref[0] = jnp.concatenate(ctx_heads, axis=-1).astype(o_ref.dtype)   # (tq, E)


def self_attention(qkv, amask, kbias, num_heads):
    # qkv: (B, T, 3E) bf16, amask: (T, T) additive f32, kbias: (B, 1, T) f32
    b, t, three_e = qkv.shape
    e = three_e // 3
    tq = _row_block(t)
    kern = functools.partial(_self_attn_kernel, num_heads=num_heads, tq=tq)
    return pl.pallas_call(
        kern,
        out_shape=jax.ShapeDtypeStruct((b, t, e), jnp.bfloat16),
        grid=(b, t // tq),
        in_specs=[pl.BlockSpec((1, t, three_e), lambda i, j: (i, 0, 0)),
                  pl.BlockSpec((tq, t), lambda i, j: (j, 0)),
                  pl.BlockSpec((1, 1, t), lambda i, j: (i, 0, 0))],
        out_specs=pl.BlockSpec((1, tq, e), lambda i, j: (i, j, 0)),
        compiler_params=_cp("parallel", "parallel"),
    )(qkv, amask, kbias)


def _cross_attn_kernel(q_ref, kv_ref, kbias_ref, o_ref, w_ref, *, num_heads):
    e = o_ref.shape[-1]
    dh = e // num_heads
    bias = kbias_ref[0]                                       # (1, S) f32
    inv_h = 1.0 / num_heads

    ctx_heads = []
    wsum = None
    for hh in range(num_heads):                               # static unroll
        q_h = q_ref[0, :, hh * dh:(hh + 1) * dh]              # (tq, dh) bf16
        k_h = kv_ref[0, :, hh * dh:(hh + 1) * dh]             # (S, dh) bf16
        v_h = kv_ref[0, :, e + hh * dh:e + (hh + 1) * dh]     # (S, dh) bf16
        s = jax.lax.dot_general(q_h, k_h, (((1,), (1,)), ((), ())),
                                preferred_element_type=jnp.float32)      # (tq, S)
        s = s + bias
        m = jnp.max(s, axis=-1, keepdims=True)
        p = jnp.exp(s - m)
        w = p / jnp.sum(p, axis=-1, keepdims=True)            # exact softmax
        wsum = w if wsum is None else wsum + w
        ctx_heads.append(jnp.dot(w.astype(jnp.bfloat16), v_h,
                                 preferred_element_type=jnp.float32))    # (tq, dh)
    o_ref[0] = jnp.concatenate(ctx_heads, axis=-1).astype(o_ref.dtype)   # (tq, E)
    w_ref[0] = (wsum * inv_h).astype(w_ref.dtype)             # head-mean weights


def cross_attention(q, kv, kbias, num_heads):
    # q: (B, T, E) bf16, kv: (B, S, 2E) bf16, kbias: (B, 1, S) additive f32
    b, t, e = q.shape
    s_len = kv.shape[1]
    tq = _row_block(t)
    kern = functools.partial(_cross_attn_kernel, num_heads=num_heads)
    return pl.pallas_call(
        kern,
        out_shape=(jax.ShapeDtypeStruct((b, t, e), jnp.bfloat16),
                   jax.ShapeDtypeStruct((b, t, s_len), jnp.float32)),
        grid=(b, t // tq),
        in_specs=[pl.BlockSpec((1, tq, e), lambda i, j: (i, j, 0)),
                  pl.BlockSpec((1, s_len, 2 * e), lambda i, j: (i, 0, 0)),
                  pl.BlockSpec((1, 1, s_len), lambda i, j: (i, 0, 0))],
        out_specs=(pl.BlockSpec((1, tq, e), lambda i, j: (i, j, 0)),
                   pl.BlockSpec((1, tq, s_len), lambda i, j: (i, j, 0))),
        compiler_params=_cp("parallel", "parallel"),
    )(q, kv, kbias)


# ---------------------------------------------------------------------------
# Decoder layer forward
# ---------------------------------------------------------------------------

def nstack_merge2seq_decoder_layer_forward(
        params, x, enc_le, enc_no, ntree_mask, hier_embed, pad_mask,
        key_pad, node_pad, incremental_state=None,
        self_attn_mask=None, self_attn_padding_mask=None,
        num_heads=4, normalize_before=False):
    # TODO(synk): the nstack_cross=True path (args.dptree_class attention over
    # leaf+node encoder states using ntree_mask / hier_embed / node_pad) has no
    # source provided; this implements the module's nstack_cross=False config.
    # Incremental decoding (prev_key/prev_value caching) is also elided.
    del enc_no, ntree_mask, hier_embed, key_pad, node_pad, incremental_state
    t, b, e = x.shape
    s_len = enc_le.shape[0]
    h = num_heads
    apply_post_ln = not normalize_before

    # one batch-major transpose up front; all later reshapes are free views.
    x_bt = jnp.transpose(x, (1, 0, 2)).reshape(b * t, e)          # (B*T, E) f32
    enc_bt = jnp.transpose(enc_le, (1, 0, 2)).reshape(b * s_len, e)

    def pre_ln(h2d, g, beta):
        return layer_norm_rows(h2d, g, beta) if normalize_before else h2d

    # ----- self-attention block (dropouts are identity at inference) -----
    res = x_bt
    h_in = pre_ln(res, params["ln_self_g"], params["ln_self_b"])
    qkv = linear_rows(h_in, params["self_w_qkv"], params["self_b_qkv"],
                      out_dtype=jnp.bfloat16)                      # (B*T, 3E) bf16
    qkv = qkv.reshape(b, t, 3 * e)                                 # free view

    amask = (self_attn_mask.astype(jnp.float32) if self_attn_mask is not None
             else jnp.zeros((t, t), jnp.float32))
    if self_attn_padding_mask is not None:
        kbias_self = jnp.where(self_attn_padding_mask, NEG_INF,
                               0.0).astype(jnp.float32).reshape(b, 1, t)
    else:
        kbias_self = jnp.zeros((b, 1, t), jnp.float32)

    ctx = self_attention(qkv, amask, kbias_self, h)                # (B, T, E) bf16
    x1 = proj_add_ln(ctx.reshape(b * t, e), params["self_wo"], params["self_bo"],
                     res, params["ln_self_g"], params["ln_self_b"],
                     apply_ln=apply_post_ln)

    # ----- encoder (cross) attention block -----
    res = x1
    c_in = pre_ln(res, params["ln_cross_g"], params["ln_cross_b"])
    q_c = linear_rows(c_in, params["cross_wq"], params["cross_bq"],
                      out_dtype=jnp.bfloat16).reshape(b, t, e)     # (B, T, E) bf16
    kv_c = linear_rows(enc_bt, params["cross_w_kv"], params["cross_b_kv"],
                       out_dtype=jnp.bfloat16).reshape(b, s_len, 2 * e)
    if pad_mask is not None:
        kbias_cross = jnp.where(pad_mask, NEG_INF,
                                0.0).astype(jnp.float32).reshape(b, 1, s_len)
    else:
        kbias_cross = jnp.zeros((b, 1, s_len), jnp.float32)

    ctx_c, attn_w = cross_attention(q_c, kv_c, kbias_cross, h)     # (B,T,E),(B,T,S)
    x2 = proj_add_ln(ctx_c.reshape(b * t, e), params["cross_wo"], params["cross_bo"],
                     res, params["ln_cross_g"], params["ln_cross_b"],
                     apply_ln=apply_post_ln)

    # ----- feed-forward block (fc2(relu(fc1(x))) + residual -> LN) -----
    res = x2
    f_in = pre_ln(res, params["ln_final_g"], params["ln_final_b"])
    x3 = ffn_add_ln(f_in, params["w1"], params["b1"], params["w2"], params["b2"],
                    res, params["ln_final_g"], params["ln_final_b"],
                    apply_ln=apply_post_ln)

    y = x3.reshape(b, t, e).transpose(1, 0, 2)                     # back to (T, B, E)
    return y, attn_w


# ---------------------------------------------------------------------------
# Deterministic parameter init (synthetic; shapes from module __init__) and
# one-time fusion/scaling prep (Q/K/V concat, 1/sqrt(Dh) folded into W_q, b_q,
# matmul weights cast to bf16 for native MXU throughput).
# ---------------------------------------------------------------------------

def _xavier(key, shape):
    limit = math.sqrt(6.0 / (shape[0] + shape[1]))
    return jax.random.uniform(key, shape, jnp.float32, -limit, limit)


def init_mha_params(key, e):
    ks = jax.random.split(key, 4)
    return {"wq": _xavier(ks[0], (e, e)), "bq": jnp.zeros((e,), jnp.float32),
            "wk": _xavier(ks[1], (e, e)), "bk": jnp.zeros((e,), jnp.float32),
            "wv": _xavier(ks[2], (e, e)), "bv": jnp.zeros((e,), jnp.float32),
            "wo": _xavier(ks[3], (e, e)), "bo": jnp.zeros((e,), jnp.float32)}


def init_layer_params(key, e, ffn_dim):
    ks = jax.random.split(key, 4)
    return {
        "self_attn": init_mha_params(ks[0], e),
        "cross_attn": init_mha_params(ks[1], e),
        "w1": _xavier(ks[2], (e, ffn_dim)), "b1": jnp.zeros((ffn_dim,), jnp.float32),
        "w2": _xavier(ks[3], (ffn_dim, e)), "b2": jnp.zeros((e,), jnp.float32),
        "ln_self_g": jnp.ones((e,), jnp.float32), "ln_self_b": jnp.zeros((e,), jnp.float32),
        "ln_cross_g": jnp.ones((e,), jnp.float32), "ln_cross_b": jnp.zeros((e,), jnp.float32),
        "ln_final_g": jnp.ones((e,), jnp.float32), "ln_final_b": jnp.zeros((e,), jnp.float32),
    }


def prepare_layer_params(raw, e, num_heads):
    dh = e // num_heads
    scaling = dh ** -0.5
    sa, ca = raw["self_attn"], raw["cross_attn"]
    bf16 = jnp.bfloat16
    return {
        # self-attention: fused QKV with scaling folded into the Q slice
        "self_w_qkv": jnp.concatenate(
            [sa["wq"] * scaling, sa["wk"], sa["wv"]], axis=1).astype(bf16),
        "self_b_qkv": jnp.concatenate([sa["bq"] * scaling, sa["bk"], sa["bv"]], axis=0),
        "self_wo": sa["wo"].astype(bf16), "self_bo": sa["bo"],
        # cross attention: scaled Q, fused KV
        "cross_wq": (ca["wq"] * scaling).astype(bf16), "cross_bq": ca["bq"] * scaling,
        "cross_w_kv": jnp.concatenate([ca["wk"], ca["wv"]], axis=1).astype(bf16),
        "cross_b_kv": jnp.concatenate([ca["bk"], ca["bv"]], axis=0),
        "cross_wo": ca["wo"].astype(bf16), "cross_bo": ca["bo"],
        "w1": raw["w1"].astype(bf16), "b1": raw["b1"],
        "w2": raw["w2"].astype(bf16), "b2": raw["b2"],
        "ln_self_g": raw["ln_self_g"], "ln_self_b": raw["ln_self_b"],
        "ln_cross_g": raw["ln_cross_g"], "ln_cross_b": raw["ln_cross_b"],
        "ln_final_g": raw["ln_final_g"], "ln_final_b": raw["ln_final_b"],
    }


# ---------------------------------------------------------------------------
# Main
# ---------------------------------------------------------------------------

if __name__ == "__main__":
    # Small but lane-aligned demo config: Dh = E // H = 128 keeps every
    # in-kernel head slice on a 128-lane boundary.
    T, S, SN, B, E, H, FFN = 8, 16, 10, 2, 512, 4, 1024

    root = jax.random.PRNGKey(0)
    k_param, k_x, k_le, k_no, k_he = jax.random.split(root, 5)

    raw_params = init_layer_params(k_param, E, FFN)
    params = prepare_layer_params(raw_params, E, H)

    x = jax.random.normal(k_x, (T, B, E), jnp.float32)          # decoder states
    enc_le = jax.random.normal(k_le, (S, B, E), jnp.float32)    # encoder leaf states
    enc_no = jax.random.normal(k_no, (SN, B, E), jnp.float32)   # encoder node states (unused path)
    hier_embed = jax.random.normal(k_he, (B, S, SN, E // H), jnp.float32)  # unused path
    ntree_mask = jnp.ones((B, S, SN), jnp.bool_)                 # unused path
    node_pad = jnp.zeros((B, SN), jnp.bool_)                     # unused path
    key_pad = jnp.zeros((B, S), jnp.bool_)                       # unused path

    # pad_mask: batch 0 unpadded, batch 1 has last 3 leaf positions padded
    pad_mask = jnp.arange(S)[None, :] >= jnp.array([S, S - 3])[:, None]

    # causal self-attention mask (additive)
    causal = jnp.where(jnp.triu(jnp.ones((T, T), jnp.bool_), k=1), NEG_INF, 0.0)

    y, attn = nstack_merge2seq_decoder_layer_forward(
        params, x, enc_le, enc_no, ntree_mask, hier_embed, pad_mask,
        key_pad, node_pad, incremental_state=None,
        self_attn_mask=causal, self_attn_padding_mask=None,
        num_heads=H, normalize_before=False)

    jax.block_until_ready((y, attn))
    assert y.shape == (T, B, E) and attn.shape == (B, T, S)
    assert bool(jnp.all(jnp.isfinite(y))) and bool(jnp.all(jnp.isfinite(attn)))
    print("KERNEL_OK")
</pallas_src>

<mosaic_0001>
module attributes {stable_mosaic.version = 11 : i64} {
  func.func @_linear_kernel(%arg0: i32, %arg1: i32, %arg2: memref<16x512xf32, #tpu.memory_space<vmem>>, %arg3: memref<512x512xbf16, #tpu.memory_space<vmem>>, %arg4: memref<1x512xf32, #tpu.memory_space<vmem>>, %arg5: memref<16x512xbf16, #tpu.memory_space<vmem>>) attributes {dimension_semantics = [#tpu.dimension_semantics<parallel>, #tpu.dimension_semantics<parallel>], iteration_bounds = array<i64: 1, 3>, scalar_prefetch = 0 : i64, scratch_operands = 0 : i64, tpu.core_type = #tpu.core_type<tc>, window_params = [{transform_indices = @transform_0, window_bounds = array<i64: 16, 512>}, {transform_indices = @transform_1, window_bounds = array<i64: 512, 512>}, {transform_indices = @transform_2, window_bounds = array<i64: 1, 512>}, {transform_indices = @transform_3, window_bounds = array<i64: 16, 512>}]} {
    %c0 = arith.constant 0 : index
    %c0_0 = arith.constant 0 : index
    %0 = vector.load %arg2[%c0, %c0_0] : memref<16x512xf32, #tpu.memory_space<vmem>>, vector<16x512xf32>
    %1 = arith.truncf %0 : vector<16x512xf32> to vector<16x512xbf16>
    %c0_1 = arith.constant 0 : index
    %c0_2 = arith.constant 0 : index
    %2 = vector.load %arg3[%c0_1, %c0_2] : memref<512x512xbf16, #tpu.memory_space<vmem>>, vector<512x512xbf16>
    %cst = arith.constant dense<0.000000e+00> : vector<16x512xf32>
    %3 = tpu.matmul %1, %2, %cst {dimension_numbers = #tpu.dot_dimension_numbers<[1], [0], [0], [1], [0, 0, 1, 1], [], []>} : vector<16x512xbf16>, vector<512x512xbf16>, vector<16x512xf32> -> vector<16x512xf32>
    %c0_3 = arith.constant 0 : index
    %c0_4 = arith.constant 0 : index
    %4 = vector.load %arg4[%c0_3, %c0_4] : memref<1x512xf32, #tpu.memory_space<vmem>>, vector<1x512xf32>
    %5 = vector.broadcast %4 : vector<1x512xf32> to vector<16x512xf32>
    %6 = arith.addf %3, %5 : vector<16x512xf32>
    %7 = arith.truncf %6 : vector<16x512xf32> to vector<16x512xbf16>
    %c0_5 = arith.constant 0 : index
    %c0_6 = arith.constant 0 : index
    %8 = vector.load %arg5[%c0_5, %c0_6] : memref<16x512xbf16, #tpu.memory_space<vmem>>, vector<16x512xbf16>
    tpu.vector_store %arg5[%c0_5, %c0_6], %7 {strides = array<i32>} : memref<16x512xbf16, #tpu.memory_space<vmem>>, vector<16x512xbf16>,
    return
  }
  func.func @transform_0(%arg0: i32, %arg1: i32) -> (i32, i32) {
    %c0_i32 = arith.constant 0 : i32
    %c0_i32_0 = arith.constant 0 : i32
    return %arg0, %c0_i32 : i32, i32
  }
  func.func @transform_1(%arg0: i32, %arg1: i32) -> (i32, i32) {
    %c0_i32 = arith.constant 0 : i32
    %c0_i32_0 = arith.constant 0 : i32
    return %c0_i32, %arg1 : i32, i32
  }
  func.func @transform_2(%arg0: i32, %arg1: i32) -> (i32, i32) {
    %c0_i32 = arith.constant 0 : i32
    %c0_i32_0 = arith.constant 0 : i32
    return %c0_i32, %arg1 : i32, i32
  }
  func.func @transform_3(%arg0: i32, %arg1: i32) -> (i32, i32) {
    %c0_i32 = arith.constant 0 : i32
    return %arg0, %arg1 : i32, i32
  }
}

</mosaic_0001>

<bundles_post_ra>
// kernel: tpu_custom_call.1
= control target key start
LH: loop header
LB: loop body
LE: loop exit
PB: predicated region body
PF: predicated region fallthrough
CT: control target
= control target key end

     0   :  { %8 = vsyncpa [#allocation3], 0  ;;  %s2379_s0 = inlined_call_operand.hbm [shape: f32[16,512], index: 0, kind: input, shape index: {}]   ;;  %s2380_s1 = inlined_call_operand.hbm [shape: bf16[512,1536], index: 1, kind: input, shape index: {}]   ;;  %s2381_s2 = inlined_call_operand.hbm [shape: f32[1,1536], index: 2, kind: input, shape index: {}]   ;;  %s2382_s3 = inlined_call_operand.hbm [shape: bf16[16,1536], index: 3, kind: output, shape index: {}]  }
   0x1   :  { %9 = vsyncpa [#allocation6], 0 }
   0x2   :  { %11 = vsyncpa [#allocation6 + $0x1], 0 }
   0x3   :  { %12 = vsyncpa [#allocation4], 0 }
   0x4   :  { %14 = vsyncpa [#allocation4 + $0x1], 0  ;;  %s2042_s12 = smov 0   ;;  %s2044_s13 = smov 0  }
   0x5   :  { %s2046_s14 = smov 0   ;;  %s2048_s15 = smov 0  }
   0x6   :  { %s2050_s16 = smov 0   ;;  %s2052_s17 = smov 0  }
   0x7 LB: > { %s29_s18 = sadd.s32 1, %s2004_s16  ;;  %s65_s19 = sadd.s32 1, %s1996_s14  ;;  %s2008_s17 = sphi %s2052_s17, %s20_s17   ;;  %s2004_s16 = sphi %s2050_s16, %s2401_s16   ;;  %s2000_s15 = sphi %s2048_s15, %s2400_s15   ;;  %s1996_s14 = sphi %s2046_s14, %s2399_s14   ;;  %s1992_s13 = sphi %s2044_s13, %s2398_s13   ;;  %s1988_s12 = sphi %s2042_s12, %s2397_s12  }
   0x8   : > { %p30_p0 = scmp.ge.s32.totalorder %s29_s18, 3  ;;  %p72_p1 = scmp.ne.s32.totalorder %s1996_s14, %s1992_s13 }
   0x9   : > { %p73_p2 = scmp.eq.s32.totalorder %s2008_s17, 0  ;;  %p1590_p4 = scmp.lt.s32.totalorder %s2008_s17, 3 }
   0xa   : > { %s2403_s18 = smov (%p30_p0, %s29_s18), 0  ;;  %s173_s21 = sand.u32 1, %s2008_s17  }
   0xb   : > { %p74_p3 = por %p73_p2, %p72_p1  ;;  %s62_s20 = ssub.s32 %s2004_s16, %s2403_s18 }
   0xc   : > { %p63_p5 = scmp.eq.s32.totalorder %s62_s20, 0  ;;  %s175_s22 = sand.u32 1, %s1996_s14  }
   0xd   : > { %s1557_s23 = sshll.u32 %s2004_s16, 8  ;;  %s1409_s25 = sshll.u32 %s175_s22, 10 }
   0xe   : > { %s2089_s24 = scalar_select %p63_p5, %s1996_s14, %s65_s19  }
   0xf   : > { %s183_s28 = scalar_lea.hbm %s2380_s1, %s1557_s23  ;;  %p2096_p6 = pnand %p1590_p4, %p74_p3 }
  0x10   : > { %s177_s30 = scalar_lea.vmem [#allocation5], %s1409_s25  ;;  %s2100_s5 = scalar_lea.sflag [#allocation6], %s173_s21 }
  0x11   : > { %s184_s4 = sshll.u32 %s177_s30, 4  ;;  %p2384_p7 = pneg %p2096_p6  ;;  %s185_s4 = int_to_ptr.vmem [resolvable:$true] %s184_s4 }
  0x12   : > { %s1855_s6 = scalar_lea.vmem %s185_s4, 16384  ;;  %s2010_s7 = smov [#allocation5]  }
  0x13   : > { %p1856_p8 = scmp.ne.s32.totalorder %s185_s4, %s1855_s6  ;;  %s1860_s8 = sshll.u32 %s2010_s7, 4  ;;  %s1861_s8 = int_to_ptr.vmem [resolvable:$false] %s1860_s8 }
  0x14   : > { %s1862_s9 = scalar_lea.vmem %s1861_s8, 32768  ;;  %p1863_p11 = scmp.lt.s32.totalorder %s185_s4, %s1861_s8 }
  0x15   : > { %p1858_p9 = pnand %p1856_p8, %p2384_p7  ;;  %p1864_p12 = scmp.lt.s32.totalorder %s1862_s9, %s1855_s6 }
  0x17   : > { %p1859_p10 = pneg %p1858_p9  ;;  %p1865_p13 = por %p1864_p12, %p1863_p11 }
  0x19   : > { %p1866_p0 = pnand %p1865_p13, %p1859_p10 }
  0x1b   : > { %1869 = shalt.err (!%p1866_p0)
}
  0x1c   : > { %s2011_s10 = smov 768   ;;  %s2012_s11 = smov 256  }
  0x1d   : > { %s2013_s19 = smov 16   ;;  %s2111_s20 = sadd.s32 4294967295, %s2008_s17  }
  0x1e   : > { %1581 = dma.hbm_to_vmem [thread:$0]  (!%p2096_p6), %s183_s28, 16384, %s185_s4, %s2100_s5, %s2011_s10, %s2012_s11, %s2013_s19  }
  0x1f   : > { %s1405_s21 = sadd.s32 4294967294, %s2008_s17   ;;  %p78_p2 = scmp.ne.s32.totalorder %s1992_s13, %s1988_s12 }
  0x20   : > { %p2383_p3 = scmp.eq.s32.totalorder %s2111_s20, 0  ;;  %p130_p4 = scmp.eq.s32.totalorder %s2111_s20, 2 }
  0x21   : > { %p136_p5 = scmp.eq.s32.totalorder %s1405_s21, 2  ;;  %p1406_p9 = scmp.ge.s32.totalorder %s2008_s17, 1 }
  0x22   : > { %p2120_p8 = por %p2383_p3, %p78_p2  ;;  %p2128_p10 = por %p130_p4, %p72_p1 }
  0x23   : > { %p2132_p11 = por %p136_p5, %p78_p2  ;;  %p143_p12 = scmp.lt.s32.totalorder %s2008_s17, 4 }
  0x24   : > { %s2388_s25 = scalar_select %p2128_p10, 1, 0 }
  0x25   : > { %s2389_s26 = scalar_select %p2132_p11, 1, 0 }
  0x26   : > { %p2137_p13 = pnand %p1406_p9, %p143_p12  ;;  %s2014_s28 = smov [#allocation2]  }
  0x27   : > { %s159_s30 = sshll.u32 %s2014_s28, 4  ;;  %s1412_s4 = sshll.u32 %s175_s22, 2  ;;  %s160_s30 = int_to_ptr.vmem [resolvable:$true] %s159_s30 }
  0x28   : > { %p1574_p0 = pneg %p2137_p13  ;;  %s1558_s6 = sshll.u32 %s2004_s16, 6 }
  0x29   : > { %s2155_s10 = scalar_lea.hbm %s2381_s2, %s1558_s6  ;;  %s198_s11 = scalar_lea.vmem [#allocation7], %s1412_s4 }
  0x2a   : > { %p2148_p1 = pnand %p1574_p0, %p2383_p3  ;;  %s206_s19 = sshll.u32 %s198_s11, 4  ;;  %s207_s19 = int_to_ptr.vmem [resolvable:$true] %s206_s19 }
  0x2b   : > { %s1881_s21 = scalar_lea.vmem %s160_s30, 1024  ;;  %p1889_p12 = scmp.lt.s32.totalorder %s160_s30, %s160_s30 }
  0x2c   : > { %p1872_p2 = pneg %p2148_p1  ;;  %p1882_p4 = scmp.ne.s32.totalorder %s160_s30, %s1881_s21 }
  0x2d   : > { %p1890_p0 = scmp.lt.s32.totalorder %s1881_s21, %s1881_s21 }
  0x2e   : > { %p1884_p5 = pnand %p1882_p4, %p1872_p2 }
  0x2f   : > { %p1891_p3 = por %p1890_p0, %p1889_p12 }
  0x30   : > { %p1885_p9 = pneg %p1884_p5 }
  0x32   : > { %p1892_p7 = pnand %p1891_p3, %p1885_p9 }
  0x34   : > { %1895 = shalt.err (!%p1892_p7)
}
  0x35   : > { %s2015_s22 = smov 512   ;;  %s2016_s28 = smov 32  }
  0x36   : > { %1577 = dma.hbm_to_vmem [thread:$0]  (!%p2148_p1), %s2379_s0, 1024, %s160_s30, [#allocation3], %s2015_s22, %s2015_s22, %s2016_s28  }
  0x37   : > { %s1909_s8 = scalar_lea.vmem %s207_s19, 64  ;;  %p2392_p10 = pneg %p2096_p6 }
  0x38   : > { %p1910_p11 = scmp.ne.s32.totalorder %s207_s19, %s1909_s8  ;;  %s2017_s9 = smov [#allocation7]  }
  0x39   : > { %s1914_s11 = sshll.u32 %s2017_s9, 4  ;;  %s1915_s11 = int_to_ptr.vmem [resolvable:$false] %s1914_s11 }
  0x3a   : > { %p1912_p2 = pnand %p1910_p11, %p2392_p10  ;;  %s1916_s21 = scalar_lea.vmem %s1915_s11, 128 }
  0x3b   : > { %p1917_p7 = scmp.lt.s32.totalorder %s207_s19, %s1915_s11  ;;  %p1918_p3 = scmp.lt.s32.totalorder %s1916_s21, %s1909_s8 }
  0x3c   : > { %p1913_p4 = pneg %p1912_p2 }
  0x3d   : > { %p1919_p5 = por %p1918_p3, %p1917_p7 }
  0x3f   : > { %p1920_p9 = pnand %p1919_p5, %p1913_p4 }
  0x41   : > { %1923 = shalt.err (!%p1920_p9)
}
  0x42   : > { %1584 = dma.hbm_to_vmem [thread:$0]  (!%p2096_p6), %s2155_s10, 64, %s207_s19, %s2100_s5  }
  0x43   : > { %215 = sbr.rel (%p2137_p13) target bundleno = 426 (0x1aa), region = 32  ;;  %p2393_p10 = scmp.eq.s32.totalorder (!%p2137_p13), %s2111_s20, 0 }
  0x48   : > { %1975 = dma.done.wait (%p2393_p10), [#allocation3], 1024   ;;  %p2394_p11 = pmov %p2393_p10 }
  0x49   : > { %s221_s30 = sand.u32 1, %s2111_s20   ;;  %s2179_s7 = sand.u32 1, %s1992_s13  }
  0x4a   : > { %1977 = vsyncadd (%p2394_p11), [#allocation3], 4294966272  ;;  %s1417_s29 = sshll.u32 %s2179_s7, 10  ;;  %s222_s22 = scalar_lea.sflag [#allocation6], %s221_s30 }
  0x4b   : > { %s2182_s28 = scalar_lea.vmem [#allocation5], %s1417_s29 }
  0x4c   : > { %1979 = dma.done.wait (%p2120_p8), %s222_s22, 16448  }
  0x4d   : > { %1981 = vsyncadd (%p2120_p8), %s222_s22, 4294950848  ;;  %v1650_v0 = vld [vmem:[%s2182_s28 + $0xe4] ss:$16 sps:$4 sm:$0xff]   ;;  %v1654_v2 = vld [vmem:[%s2182_s28 + $0xe0] ss:$16 sps:$4 sm:$0xff]   ;;  %s1418_s5 = sshll.u32 %s2179_s7, 2 }
  0x4e   : > { %v1652_v1 = vld [vmem:[%s2182_s28 + $0x2e4] ss:$16 sps:$4 sm:$0xff]   ;;  %1069 = vmatprep.subr.bf16.mxu0 %v1650_v0  ;;  %v1655_v3 = vld [vmem:[%s2182_s28 + $0x2e0] ss:$16 sps:$4 sm:$0xff]   ;;  %v268_v46 = vld [vmem:[#allocation2 + $0x8] sm:$0xff]  ;;  %s234_s20 = scalar_lea.vmem [#allocation7], %s1418_s5 }
  0x4f   : > { %1112 = vmatprep.subr.bf16.mxu1 %v1652_v1  ;;  %v1656_v4 = vld [vmem:[%s2182_s28 + $0xc4] ss:$16 sps:$4 sm:$0xff]   ;;  %1070 = vmatpush1.bf16.msra.mxu0 %v1654_v2  ;;  %v1660_v6 = vld [vmem:[%s2182_s28 + $0xc0] ss:$16 sps:$4 sm:$0xff]   ;;  %v272_v47 = vld [vmem:[#allocation2 + $0x28] sm:$0xff]  ;;  %s1419_s23 = sshll.u32 %s2179_s7, 5 }
  0x50   : > { %1113 = vmatpush1.bf16.msra.mxu1 %v1655_v3  ;;  %v1658_v5 = vld [vmem:[%s2182_s28 + $0x2c4] ss:$16 sps:$4 sm:$0xff]   ;;  %1071 = vmatprep.subr.bf16.mxu0 %v1656_v4  ;;  %v1661_v7 = vld [vmem:[%s2182_s28 + $0x2c0] ss:$16 sps:$4 sm:$0xff]   ;;  %v270_v48 = vld [vmem:[#allocation2 + $0x18] sm:$0xff]  ;;  %v276_v53 = vpack.c.bf16 %v272_v47, %v268_v46  ;;  %s261_s27 = scalar_lea.vmem [#allocation8], %s1419_s23 }
  0x51   : > { %1114 = vmatprep.subr.bf16.mxu1 %v1658_v5  ;;  %v1662_v8 = vld [vmem:[%s2182_s28 + $0xa4] ss:$16 sps:$4 sm:$0xff]   ;;  %v1666_v10 = vld [vmem:[%s2182_s28 + $0xa0] ss:$16 sps:$4 sm:$0xff]   ;;  %v274_v49 = vld [vmem:[#allocation2 + $0x38] sm:$0xff]  ;;  %s1286_s10 = sshll.u32 %s261_s27, 4  ;;  %s2327_s10 = int_to_ptr.vmem [resolvable:$true] %s1286_s10 }
  0x52   : > { %v1664_v9 = vld [vmem:[%s2182_s28 + $0x2a4] ss:$16 sps:$4 sm:$0xff]   ;;  %v1667_v11 = vld [vmem:[%s2182_s28 + $0x2a0] ss:$16 sps:$4 sm:$0xff]   ;;  %v278_v54 = vpack.c.bf16 %v274_v49, %v270_v48  ;;  %1101 = vmatprep.mubr.bf16.mxu0 %v276_v53  ;;  %v1794_v46 = vld [vmem:[%s2182_s28 + $0x1e8] ss:$16 sps:$4 sm:$0xff]  }
  0x53   : > { %1072 = vmatpush1.bf16.msra.mxu0 %v1660_v6  ;;  %v1668_v12 = vld [vmem:[%s2182_s28 + $0x84] ss:$16 sps:$4 sm:$0xff]   ;;  %v1672_v14 = vld [vmem:[%s2182_s28 + $0x80] ss:$16 sps:$4 sm:$0xff]   ;;  %v1797_v47 = vld [vmem:[%s2182_s28 + $0x3e8] ss:$16 sps:$4 sm:$0xff]  }
  0x54   : > { %1115 = vmatpush1.bf16.msra.mxu1 %v1661_v7  ;;  %1073 = vmatprep.subr.bf16.mxu0 %v1662_v8  ;;  %v1670_v13 = vld [vmem:[%s2182_s28 + $0x284] ss:$16 sps:$4 sm:$0xff]   ;;  %v1673_v15 = vld [vmem:[%s2182_s28 + $0x280] ss:$16 sps:$4 sm:$0xff]   ;;  %v1802_v48 = vld [vmem:[%s2182_s28 + $0x1cc] ss:$16 sps:$4 sm:$0xff]  }
  0x55   : > { %1116 = vmatprep.subr.bf16.mxu1 %v1664_v9  ;;  %v1674_v16 = vld [vmem:[%s2182_s28 + $0x64] ss:$16 sps:$4 sm:$0xff]   ;;  %v1678_v18 = vld [vmem:[%s2182_s28 + $0x60] ss:$16 sps:$4 sm:$0xff]   ;;  %1144 = vmatprep.mubr.bf16.mxu1 %v278_v54  ;;  %v1805_v49 = vld [vmem:[%s2182_s28 + $0x3cc] ss:$16 sps:$4 sm:$0xff]  }
  0x56   : > { %v1676_v17 = vld [vmem:[%s2182_s28 + $0x264] ss:$16 sps:$4 sm:$0xff]   ;;  %v1679_v19 = vld [vmem:[%s2182_s28 + $0x260] ss:$16 sps:$4 sm:$0xff]   ;;  %s1563_s19 = sshll.u32 %s2000_s15, 8  ;;  %s1270_s9 = scalar_lea.sflag [#allocation4], %s2179_s7 }
  0x57   : > { %1074 = vmatpush1.bf16.msra.mxu0 %v1666_v10  ;;  %v1680_v20 = vld [vmem:[%s2182_s28 + $0x44] ss:$16 sps:$4 sm:$0xff]   ;;  %v1684_v22 = vld [vmem:[%s2182_s28 + $0x40] ss:$16 sps:$4 sm:$0xff]   ;;  %v1748_v10 = vld [vmem:[%s2182_s28 + $0xec] ss:$16 sps:$4 sm:$0xff]   ;;  %s2332_s8 = scalar_lea.hbm %s2382_s3, %s1563_s19 }
  0x58   : > { %1117 = vmatpush1.bf16.msra.mxu1 %v1667_v11  ;;  %1075 = vmatprep.subr.bf16.mxu0 %v1668_v12  ;;  %v1682_v21 = vld [vmem:[%s2182_s28 + $0x244] ss:$16 sps:$4 sm:$0xff]   ;;  %v1685_v23 = vld [vmem:[%s2182_s28 + $0x240] ss:$16 sps:$4 sm:$0xff]   ;;  %v1751_v11 = vld [vmem:[%s2182_s28 + $0x2ec] ss:$16 sps:$4 sm:$0xff]  }
  0x59   : > { %1118 = vmatprep.subr.bf16.mxu1 %v1670_v13  ;;  %v1686_v24 = vld [vmem:[%s2182_s28 + $0x24] ss:$16 sps:$4 sm:$0xff]   ;;  %v1690_v26 = vld [vmem:[%s2182_s28 + $0x20] ss:$16 sps:$4 sm:$0xff]   ;;  %s1924_s11 = scalar_lea.vmem %s2327_s10, 512  ;;  %p2395_p8 = scmp.ne.s32.totalorder %s2388_s25, 0 }
  0x5a   : > { %v1688_v25 = vld [vmem:[%s2182_s28 + $0x224] ss:$16 sps:$4 sm:$0xff]   ;;  %v1691_v27 = vld [vmem:[%s2182_s28 + $0x220] ss:$16 sps:$4 sm:$0xff]   ;;  %p1925_p6 = scmp.ne.s32.totalorder %s2327_s10, %s1924_s11  ;;  %s2018_s15 = smov [#allocation8]  }
  0x5b   : > { %1076 = vmatpush1.bf16.msra.mxu0 %v1672_v14  ;;  %v1692_v28 = vld [vmem:[%s2182_s28 + $0x4] ss:$16 sps:$4 sm:$0xff]   ;;  %v1696_v30 = vld [vmem:[%s2182_s28] ss:$16 sps:$4 sm:$0xff]   ;;  %v1746_v14 = vld [vmem:[%s2182_s28 + $0xe8] ss:$16 sps:$4 sm:$0xff]  }
  0x5c   : > { %1119 = vmatpush1.bf16.msra.mxu1 %v1673_v15  ;;  %1077 = vmatprep.subr.bf16.mxu0 %v1674_v16  ;;  %v1694_v29 = vld [vmem:[%s2182_s28 + $0x204] ss:$16 sps:$4 sm:$0xff]   ;;  %v1697_v31 = vld [vmem:[%s2182_s28 + $0x200] ss:$16 sps:$4 sm:$0xff]   ;;  %v1749_v15 = vld [vmem:[%s2182_s28 + $0x2e8] ss:$16 sps:$4 sm:$0xff]   ;;  %p1926_p13 = pnand %p1925_p6, %p2395_p8 }
  0x5d   : > { %1120 = vmatprep.subr.bf16.mxu1 %v1676_v17  ;;  %v1698_v32 = vld [vmem:[%s2182_s28 + $0x1e4] ss:$16 sps:$4 sm:$0xff]   ;;  %v1702_v34 = vld [vmem:[%s2182_s28 + $0x1e0] ss:$16 sps:$4 sm:$0xff]   ;;  %v1754_v16 = vld [vmem:[%s2182_s28 + $0xcc] ss:$16 sps:$4 sm:$0xff]  }
  0x5e   : > { %v1700_v33 = vld [vmem:[%s2182_s28 + $0x3e4] ss:$16 sps:$4 sm:$0xff]   ;;  %v1703_v35 = vld [vmem:[%s2182_s28 + $0x3e0] ss:$16 sps:$4 sm:$0xff]   ;;  %v1757_v17 = vld [vmem:[%s2182_s28 + $0x2cc] ss:$16 sps:$4 sm:$0xff]   ;;  %p1927_p1 = pneg %p1926_p13 }
  0x5f   : > { %1078 = vmatpush1.bf16.msra.mxu0 %v1678_v18  ;;  %v1704_v36 = vld [vmem:[%s2182_s28 + $0x1c4] ss:$16 sps:$4 sm:$0xff]   ;;  %v1708_v38 = vld [vmem:[%s2182_s28 + $0x1c0] ss:$16 sps:$4 sm:$0xff]   ;;  %v1752_v18 = vld [vmem:[%s2182_s28 + $0xc8] ss:$16 sps:$4 sm:$0xff]  }
  0x60   : > { %1121 = vmatpush1.bf16.msra.mxu1 %v1679_v19  ;;  %1079 = vmatprep.subr.bf16.mxu0 %v1680_v20  ;;  %v1706_v37 = vld [vmem:[%s2182_s28 + $0x3c4] ss:$16 sps:$4 sm:$0xff]   ;;  %v1709_v39 = vld [vmem:[%s2182_s28 + $0x3c0] ss:$16 sps:$4 sm:$0xff]   ;;  %v1755_v19 = vld [vmem:[%s2182_s28 + $0x2c8] ss:$16 sps:$4 sm:$0xff]  }
  0x61   : > { %1122 = vmatprep.subr.bf16.mxu1 %v1682_v21  ;;  %v1710_v40 = vld [vmem:[%s2182_s28 + $0x1a4] ss:$16 sps:$4 sm:$0xff]   ;;  %v1714_v42 = vld [vmem:[%s2182_s28 + $0x1a0] ss:$16 sps:$4 sm:$0xff]   ;;  %v1760_v20 = vld [vmem:[%s2182_s28 + $0xac] ss:$16 sps:$4 sm:$0xff]  }
  0x62   : > { %v1712_v41 = vld [vmem:[%s2182_s28 + $0x3a4] ss:$16 sps:$4 sm:$0xff]   ;;  %v1715_v43 = vld [vmem:[%s2182_s28 + $0x3a0] ss:$16 sps:$4 sm:$0xff]   ;;  %v1763_v21 = vld [vmem:[%s2182_s28 + $0x2ac] ss:$16 sps:$4 sm:$0xff]  }
  0x63   : > { %1080 = vmatpush1.bf16.msra.mxu0 %v1684_v22  ;;  %v1716_v44 = vld [vmem:[%s2182_s28 + $0x184] ss:$16 sps:$4 sm:$0xff]   ;;  %v1720_v50 = vld [vmem:[%s2182_s28 + $0x180] ss:$16 sps:$4 sm:$0xff]   ;;  %v1758_v22 = vld [vmem:[%s2182_s28 + $0xa8] ss:$16 sps:$4 sm:$0xff]  }
  0x64   : > { %1123 = vmatpush1.bf16.msra.mxu1 %v1685_v23  ;;  %1081 = vmatprep.subr.bf16.mxu0 %v1686_v24  ;;  %v1718_v45 = vld [vmem:[%s2182_s28 + $0x384] ss:$16 sps:$4 sm:$0xff]   ;;  %v1721_v51 = vld [vmem:[%s2182_s28 + $0x380] ss:$16 sps:$4 sm:$0xff]   ;;  %v1761_v23 = vld [vmem:[%s2182_s28 + $0x2a8] ss:$16 sps:$4 sm:$0xff]  }
  0x65   : > { %1124 = vmatprep.subr.bf16.mxu1 %v1688_v25  ;;  %v1722_v52 = vld [vmem:[%s2182_s28 + $0x164] ss:$16 sps:$4 sm:$0xff]   ;;  %v1726_v56 = vld [vmem:[%s2182_s28 + $0x160] ss:$16 sps:$4 sm:$0xff]   ;;  %v1766_v24 = vld [vmem:[%s2182_s28 + $0x8c] ss:$16 sps:$4 sm:$0xff]  }
  0x66   : > { %v1724_v55 = vld [vmem:[%s2182_s28 + $0x364] ss:$16 sps:$4 sm:$0xff]   ;;  %v1727_v57 = vld [vmem:[%s2182_s28 + $0x360] ss:$16 sps:$4 sm:$0xff]   ;;  %v1769_v25 = vld [vmem:[%s2182_s28 + $0x28c] ss:$16 sps:$4 sm:$0xff]  }
  0x67   : > { %1082 = vmatpush1.bf16.msra.mxu0 %v1690_v26  ;;  %v1728_v58 = vld [vmem:[%s2182_s28 + $0x144] ss:$16 sps:$4 sm:$0xff]   ;;  %v1732_v60 = vld [vmem:[%s2182_s28 + $0x140] ss:$16 sps:$4 sm:$0xff]   ;;  %v1764_v26 = vld [vmem:[%s2182_s28 + $0x88] ss:$16 sps:$4 sm:$0xff]  }
  0x68   : > { %1125 = vmatpush1.bf16.msra.mxu1 %v1691_v27  ;;  %1083 = vmatprep.subr.bf16.mxu0 %v1692_v28  ;;  %v1730_v59 = vld [vmem:[%s2182_s28 + $0x344] ss:$16 sps:$4 sm:$0xff]   ;;  %v1733_v61 = vld [vmem:[%s2182_s28 + $0x340] ss:$16 sps:$4 sm:$0xff]   ;;  %v1767_v27 = vld [vmem:[%s2182_s28 + $0x288] ss:$16 sps:$4 sm:$0xff]  }
  0x69   : > { %1126 = vmatprep.subr.bf16.mxu1 %v1694_v29  ;;  %v1734_v62 = vld [vmem:[%s2182_s28 + $0x124] ss:$16 sps:$4 sm:$0xff]   ;;  %v1738_v0 = vld [vmem:[%s2182_s28 + $0x120] ss:$16 sps:$4 sm:$0xff]   ;;  %v1772_v28 = vld [vmem:[%s2182_s28 + $0x6c] ss:$16 sps:$4 sm:$0xff]  }
  0x6a   : > { %v1736_v63 = vld [vmem:[%s2182_s28 + $0x324] ss:$16 sps:$4 sm:$0xff]   ;;  %v1739_v1 = vld [vmem:[%s2182_s28 + $0x320] ss:$16 sps:$4 sm:$0xff]   ;;  %v1775_v29 = vld [vmem:[%s2182_s28 + $0x26c] ss:$16 sps:$4 sm:$0xff]  }
  0x6b   : > { %1084 = vmatpush1.bf16.msra.mxu0 %v1696_v30  ;;  %v1740_v2 = vld [vmem:[%s2182_s28 + $0x104] ss:$16 sps:$4 sm:$0xff]   ;;  %v1744_v4 = vld [vmem:[%s2182_s28 + $0x100] ss:$16 sps:$4 sm:$0xff]   ;;  %v1770_v30 = vld [vmem:[%s2182_s28 + $0x68] ss:$16 sps:$4 sm:$0xff]  }
  0x6c   : > { %1127 = vmatpush1.bf16.msra.mxu1 %v1697_v31  ;;  %1085 = vmatprep.subr.bf16.mxu0 %v1698_v32  ;;  %v1742_v3 = vld [vmem:[%s2182_s28 + $0x304] ss:$16 sps:$4 sm:$0xff]   ;;  %v1745_v5 = vld [vmem:[%s2182_s28 + $0x300] ss:$16 sps:$4 sm:$0xff]   ;;  %v1773_v31 = vld [vmem:[%s2182_s28 + $0x268] ss:$16 sps:$4 sm:$0xff]  }
  0x6d   : > { %1128 = vmatprep.subr.bf16.mxu1 %v1700_v33  ;;  %v267_v6 = vld [vmem:[#allocation2] sm:$0xff]  ;;  %v269_v8 = vld [vmem:[#allocation2 + $0x10] sm:$0xff]  ;;  %v1778_v32 = vld [vmem:[%s2182_s28 + $0x4c] ss:$16 sps:$4 sm:$0xff]   ;;  %s1928_s21 = sshll.u32 %s2018_s15, 4  ;;  %s1929_s21 = int_to_ptr.vmem [resolvable:$false] %s1928_s21 }
  0x6e   : > { %v271_v7 = vld [vmem:[#allocation2 + $0x20] sm:$0xff]  ;;  %v273_v9 = vld [vmem:[#allocation2 + $0x30] sm:$0xff]  ;;  %v1781_v33 = vld [vmem:[%s2182_s28 + $0x24c] ss:$16 sps:$4 sm:$0xff]   ;;  %s1930_s30 = scalar_lea.vmem %s1929_s21, 1024  ;;  %p1931_p12 = scmp.lt.s32.totalorder %s2327_s10, %s1929_s21 }
  0x6f   : > { %1086 = vmatpush2.bf16.msra.mxu0 %v1702_v34  ;;  %v2254_v12 = vpack.c.bf16 %v271_v7, %v267_v6  ;;  %v2256_v13 = vpack.c.bf16 %v273_v9, %v269_v8  ;;  %v1776_v34 = vld [vmem:[%s2182_s28 + $0x48] ss:$16 sps:$4 sm:$0xff]   ;;  %v1838_v8 = vld [vmem:[%s2182_s28 + $0x10c] ss:$16 sps:$4 sm:$0xff]   ;;  %p1932_p0 = scmp.lt.s32.totalorder %s1930_s30, %s1924_s11 }
  0x70   : > { %1129 = vmatpush2.bf16.msra.mxu1 %v1703_v35  ;;  %1087 = vmatprep.subr.bf16.mxu0 %v1704_v36  ;;  %v1779_v35 = vld [vmem:[%s2182_s28 + $0x248] ss:$16 sps:$4 sm:$0xff]   ;;  %v1784_v36 = vld [vmem:[%s2182_s28 + $0x2c] ss:$16 sps:$4 sm:$0xff]  }
  0x71   : > { %1130 = vmatprep.subr.bf16.mxu1 %v1706_v37  ;;  %v1787_v37 = vld [vmem:[%s2182_s28 + $0x22c] ss:$16 sps:$4 sm:$0xff]   ;;  %v1830_v6 = vld [vmem:[%s2182_s28 + $0x128] ss:$16 sps:$4 sm:$0xff]   ;;  %p1933_p2 = por %p1932_p0, %p1931_p12 }
  0x72   : > { %v1833_v7 = vld [vmem:[%s2182_s28 + $0x328] ss:$16 sps:$4 sm:$0xff]   ;;  %v1841_v9 = vld [vmem:[%s2182_s28 + $0x30c] ss:$16 sps:$4 sm:$0xff]  }
  0x73   : > { %1088 = vmatpush2.bf16.msra.mxu0 %v1708_v38  ;;  %v1782_v38 = vld [vmem:[%s2182_s28 + $0x28] ss:$16 sps:$4 sm:$0xff]   ;;  %p1934_p4 = pnand %p1933_p2, %p1927_p1 }
  0x74   : > { %1131 = vmatpush2.bf16.msra.mxu1 %v1709_v39  ;;  %1089 = vmatprep.subr.bf16.mxu0 %v1710_v40  ;;  %v1785_v39 = vld [vmem:[%s2182_s28 + $0x228] ss:$16 sps:$4 sm:$0xff]   ;;  %v1790_v40 = vld [vmem:[%s2182_s28 + $0xc] ss:$16 sps:$4 sm:$0xff]  }
  0x75   : > { %1132 = vmatprep.subr.bf16.mxu1 %v1712_v41  ;;  %v1793_v41 = vld [vmem:[%s2182_s28 + $0x20c] ss:$16 sps:$4 sm:$0xff]  }
  0x77   : > { %1090 = vmatpush2.bf16.msra.mxu0 %v1714_v42  ;;  %v1788_v42 = vld [vmem:[%s2182_s28 + $0x8] ss:$16 sps:$4 sm:$0xff]  }
  0x78   : > { %1133 = vmatpush2.bf16.msra.mxu1 %v1715_v43  ;;  %1091 = vmatprep.subr.bf16.mxu0 %v1716_v44  ;;  %v1791_v43 = vld [vmem:[%s2182_s28 + $0x208] ss:$16 sps:$4 sm:$0xff]   ;;  %v1796_v44 = vld [vmem:[%s2182_s28 + $0x1ec] ss:$16 sps:$4 sm:$0xff]  }
  0x79   : > { %1134 = vmatprep.subr.bf16.mxu1 %v1718_v45  ;;  %v1799_v45 = vld [vmem:[%s2182_s28 + $0x3ec] ss:$16 sps:$4 sm:$0xff]  }
  0x7b   : > { %1092 = vmatpush2.bf16.msra.mxu0 %v1720_v50  ;;  %v1800_v50 = vld [vmem:[%s2182_s28 + $0x1c8] ss:$16 sps:$4 sm:$0xff]  }
  0x7c   : > { %1135 = vmatpush2.bf16.msra.mxu1 %v1721_v51  ;;  %1093 = vmatprep.subr.bf16.mxu0 %v1722_v52  ;;  %v1803_v51 = vld [vmem:[%s2182_s28 + $0x3c8] ss:$16 sps:$4 sm:$0xff]   ;;  %v1808_v52 = vld [vmem:[%s2182_s28 + $0x1ac] ss:$16 sps:$4 sm:$0xff]  }
  0x7d   : > { %1136 = vmatprep.subr.bf16.mxu1 %v1724_v55  ;;  %v1809_v55 = vld [vmem:[%s2182_s28 + $0x3a8] ss:$16 sps:$4 sm:$0xff]  }
  0x7f   : > { %1094 = vmatpush2.bf16.msra.mxu0 %v1726_v56  ;;  %v1814_v56 = vld [vmem:[%s2182_s28 + $0x18c] ss:$16 sps:$4 sm:$0xff]  }
  0x80   : > { %1137 = vmatpush2.bf16.msra.mxu1 %v1727_v57  ;;  %1095 = vmatprep.subr.bf16.mxu0 %v1728_v58  ;;  %v1817_v57 = vld [vmem:[%s2182_s28 + $0x38c] ss:$16 sps:$4 sm:$0xff]   ;;  %v1812_v58 = vld [vmem:[%s2182_s28 + $0x188] ss:$16 sps:$4 sm:$0xff]  }
  0x81   : > { %1138 = vmatprep.subr.bf16.mxu1 %v1730_v59  ;;  %v1815_v59 = vld [vmem:[%s2182_s28 + $0x388] ss:$16 sps:$4 sm:$0xff]  }
  0x83   : > { %1096 = vmatpush2.bf16.msra.mxu0 %v1732_v60  ;;  %v1820_v60 = vld [vmem:[%s2182_s28 + $0x16c] ss:$16 sps:$4 sm:$0xff]  }
  0x84   : > { %1139 = vmatpush2.bf16.msra.mxu1 %v1733_v61  ;;  %1097 = vmatprep.subr.bf16.mxu0 %v1734_v62  ;;  %v1823_v61 = vld [vmem:[%s2182_s28 + $0x36c] ss:$16 sps:$4 sm:$0xff]   ;;  %v1818_v62 = vld [vmem:[%s2182_s28 + $0x168] ss:$16 sps:$4 sm:$0xff]  }
  0x85   : > { %1140 = vmatprep.subr.bf16.mxu1 %v1736_v63  ;;  %v1821_v63 = vld [vmem:[%s2182_s28 + $0x368] ss:$16 sps:$4 sm:$0xff]  }
  0x87   : > { %1098 = vmatpush2.bf16.msra.mxu0 %v1738_v0  ;;  %v1826_v0 = vld [vmem:[%s2182_s28 + $0x14c] ss:$16 sps:$4 sm:$0xff]  }
  0x88   : > { %1141 = vmatpush2.bf16.msra.mxu1 %v1739_v1  ;;  %1099 = vmatprep.subr.bf16.mxu0 %v1740_v2  ;;  %v1829_v1 = vld [vmem:[%s2182_s28 + $0x34c] ss:$16 sps:$4 sm:$0xff]   ;;  %v1824_v2 = vld [vmem:[%s2182_s28 + $0x148] ss:$16 sps:$4 sm:$0xff]  }
  0x89   : > { %1142 = vmatprep.subr.bf16.mxu1 %v1742_v3  ;;  %v1827_v3 = vld [vmem:[%s2182_s28 + $0x348] ss:$16 sps:$4 sm:$0xff]  }
  0x8b   : > { %1100 = vmatpush2.bf16.msra.mxu0 %v1744_v4  ;;  %v1832_v4 = vld [vmem:[%s2182_s28 + $0x12c] ss:$16 sps:$4 sm:$0xff]  }
  0x8c   : > { %1143 = vmatpush2.bf16.msra.mxu1 %v1745_v5  ;;  %1155 = vmatprep.subr.bf16.mxu0 %v1748_v10  ;;  %v1835_v5 = vld [vmem:[%s2182_s28 + $0x32c] ss:$16 sps:$4 sm:$0xff]   ;;  %v1836_v10 = vld [vmem:[%s2182_s28 + $0x108] ss:$16 sps:$4 sm:$0xff]  }
  0x8d   : > { %1198 = vmatprep.subr.bf16.mxu1 %v1751_v11  ;;  %v1839_v11 = vld [vmem:[%s2182_s28 + $0x308] ss:$16 sps:$4 sm:$0xff]  }
  0x8e   : > { %1102 = vmatmul.mubr.bf16.vlgmr.msra.gmra.mxu0 %v2254_v12 }
  0x8f   : > { %1145 = vmatmul.mubr.bf16.vlgmr.msra.gmra.mxu1 %v2256_v13  ;;  %1156 = vmatpush1.bf16.msra.mxu0 %v1746_v14  ;;  %v409_v14 = vlaneseq }
  0x90   : > { %1199 = vmatpush1.bf16.msra.mxu1 %v1749_v15  ;;  %1157 = vmatprep.subr.bf16.mxu0 %v1754_v16 }
  0x91   : > { %1200 = vmatprep.subr.bf16.mxu1 %v1757_v17  ;;  %1187 = vmatprep.mubr.bf16.mxu0 %v276_v53  ;;  %v1811_v53 = vld [vmem:[%s2182_s28 + $0x3ac] ss:$16 sps:$4 sm:$0xff]   ;;  %v410_v15 = vshrl.u32 %v409_v14, 7  ;;  %v407_v17 = vld [vmem:[%s234_s20] sm:$0xf] }
  0x92   : > { %1230 = vmatprep.mubr.bf16.mxu1 %v278_v54  ;;  %v1806_v54 = vld [vmem:[%s2182_s28 + $0x1a8] ss:$16 sps:$4 sm:$0xff]  }
  0x93   : > { %1158 = vmatpush1.bf16.msra.mxu0 %v1752_v18  ;;  %v419_v16 = vsub.s32 2, %v410_v15 }
  0x94   : > { %1201 = vmatpush1.bf16.msra.mxu1 %v1755_v19  ;;  %1159 = vmatprep.subr.bf16.mxu0 %v1760_v20  ;;  %v423_v19 = vsub.s32 3, %v410_v15 }
  0x95   : > { %1202 = vmatprep.subr.bf16.mxu1 %v1763_v21  ;;  %v420_v18 = vrot.slane %v407_v17, %v419_v16  ;;  %v411_v21 = vsub.s32 0, %v410_v15 }
  0x96   : > { %v424_v20 = vrot.slane %v407_v17, %v423_v19 }
  0x97   : > { %1160 = vmatpush1.bf16.msra.mxu0 %v1758_v22  ;;  %v415_v22 = vsub.s32 1, %v410_v15 }
  0x98   : > { %1203 = vmatpush1.bf16.msra.mxu1 %v1761_v23  ;;  %1161 = vmatprep.subr.bf16.mxu0 %v1766_v24  ;;  %v412_v23 = vrot.slane %v407_v17, %v411_v21 }
  0x99   : > { %1204 = vmatprep.subr.bf16.mxu1 %v1769_v25  ;;  %v416_v24 = vrot.slane %v407_v17, %v415_v22 }
  0x9b   : > { %1162 = vmatpush1.bf16.msra.mxu0 %v1764_v26 }
  0x9c   : > { %1205 = vmatpush1.bf16.msra.mxu1 %v1767_v27  ;;  %1163 = vmatprep.subr.bf16.mxu0 %v1772_v28 }
  0x9d   : > { %1206 = vmatprep.subr.bf16.mxu1 %v1775_v29 }
  0x9f   : > { %1164 = vmatpush1.bf16.msra.mxu0 %v1770_v30 }
  0xa0   : > { %1207 = vmatpush1.bf16.msra.mxu1 %v1773_v31  ;;  %1165 = vmatprep.subr.bf16.mxu0 %v1778_v32 }
  0xa1   : > { %1208 = vmatprep.subr.bf16.mxu1 %v1781_v33 }
  0xa3   : > { %1166 = vmatpush1.bf16.msra.mxu0 %v1776_v34 }
  0xa4   : > { %1209 = vmatpush1.bf16.msra.mxu1 %v1779_v35  ;;  %1167 = vmatprep.subr.bf16.mxu0 %v1784_v36 }
  0xa5   : > { %1210 = vmatprep.subr.bf16.mxu1 %v1787_v37 }
  0xa7   : > { %1168 = vmatpush1.bf16.msra.mxu0 %v1782_v38 }
  0xa8   : > { %1211 = vmatpush1.bf16.msra.mxu1 %v1785_v39  ;;  %1169 = vmatprep.subr.bf16.mxu0 %v1790_v40 }
  0xa9   : > { %1212 = vmatprep.subr.bf16.mxu1 %v1793_v41 }
  0xab   : > { %1170 = vmatpush1.bf16.msra.mxu0 %v1788_v42 }
  0xac   : > { %1213 = vmatpush1.bf16.msra.mxu1 %v1791_v43  ;;  %1171 = vmatprep.subr.bf16.mxu0 %v1796_v44 }
  0xad   : > { %1214 = vmatprep.subr.bf16.mxu1 %v1799_v45 }
  0xaf   : > { %1172 = vmatpush2.bf16.msra.mxu0 %v1794_v46 }
  0xb0   : > { %1215 = vmatpush2.bf16.msra.mxu1 %v1797_v47  ;;  %1173 = vmatprep.subr.bf16.mxu0 %v1802_v48 }
  0xb1   : > { %1216 = vmatprep.subr.bf16.mxu1 %v1805_v49 }
  0xb3   : > { %1174 = vmatpush2.bf16.msra.mxu0 %v1800_v50 }
  0xb4   : > { %1217 = vmatpush2.bf16.msra.mxu1 %v1803_v51  ;;  %1175 = vmatprep.subr.bf16.mxu0 %v1808_v52 }
  0xb5   : > { %1218 = vmatprep.subr.bf16.mxu1 %v1811_v53 }
  0xb7   : > { %1176 = vmatpush2.bf16.msra.mxu0 %v1806_v54 }
  0xb8   : > { %1219 = vmatpush2.bf16.msra.mxu1 %v1809_v55  ;;  %1177 = vmatprep.subr.bf16.mxu0 %v1814_v56 }
  0xb9   : > { %1220 = vmatprep.subr.bf16.mxu1 %v1817_v57 }
  0xbb   : > { %1178 = vmatpush2.bf16.msra.mxu0 %v1812_v58 }
  0xbc   : > { %1221 = vmatpush2.bf16.msra.mxu1 %v1815_v59  ;;  %1179 = vmatprep.subr.bf16.mxu0 %v1820_v60 }
  0xbd   : > { %1222 = vmatprep.subr.bf16.mxu1 %v1823_v61 }
  0xbf   : > { %1180 = vmatpush2.bf16.msra.mxu0 %v1818_v62 }
  0xc0   : > { %1223 = vmatpush2.bf16.msra.mxu1 %v1821_v63  ;;  %1181 = vmatprep.subr.bf16.mxu0 %v1826_v0 }
  0xc1   : > { %1224 = vmatprep.subr.bf16.mxu1 %v1829_v1 }
  0xc3   : > { %1182 = vmatpush2.bf16.msra.mxu0 %v1824_v2 }
  0xc4   : > { %1225 = vmatpush2.bf16.msra.mxu1 %v1827_v3  ;;  %1183 = vmatprep.subr.bf16.mxu0 %v1832_v4 }
  0xc5   : > { %1226 = vmatprep.subr.bf16.mxu1 %v1835_v5 }
  0xc7   : > { %1184 = vmatpush2.bf16.msra.mxu0 %v1830_v6 }
  0xc8   : > { %1227 = vmatpush2.bf16.msra.mxu1 %v1833_v7  ;;  %1185 = vmatprep.subr.bf16.mxu0 %v1838_v8 }
  0xc9   : > { %1228 = vmatprep.subr.bf16.mxu1 %v1841_v9 }
  0xcb   : > { %1186 = vmatpush2.bf16.msra.mxu0 %v1836_v10 }
  0xcc   : > { %1229 = vmatpush2.bf16.msra.mxu1 %v1839_v11 }
  0xce   : > { %1188 = vmatmul.mubr.bf16.vlgmr.msra.gmra.mxu0 %v2254_v12 }
  0xcf   : > { %1231 = vmatmul.mubr.bf16.vlgmr.msra.gmra.mxu1 %v2256_v13 }
 0x14e   : > { %v1103_v25 = vpop.f32.mrf.mxu0 }
 0x14f   : > { %v1146_v26 = vpop.f32.mrf.mxu1  ;;  %v1104_v27 = vadd.f32 %v1103_v25, %v412_v23 }
 0x150   : > { %v1105_v12 = vpop.f32.mrf.mxu0 }
 0x151   : > { %v1148_v28 = vpop.f32.mrf.mxu1  ;;  %v1147_v13 = vadd.f32 %v1146_v26, %v1104_v27  ;;  %v1106_v29 = vadd.f32 %v1105_v12, %v416_v24 }
 0x152   : > { %v1107_v30 = vpop.f32.mrf.mxu0 }
 0x153   : > { %v1150_v31 = vpop.f32.mrf.mxu1  ;;  %v1149_v32 = vadd.f32 %v1148_v28, %v1106_v29  ;;  %v1108_v33 = vadd.f32 %v1107_v30, %v412_v23 }
 0x154   : > { %v1109_v34 = vpop.f32.mrf.mxu0 }
 0x155   : > { %v1559_v35 = vpack.c.bf16 %v1149_v32, %v1147_v13  ;;  %v1110_v36 = vadd.f32 %v1109_v34, %v416_v24  ;;  %v1152_v37 = vpop.f32.mrf.mxu1  ;;  %v1151_v38 = vadd.f32 %v1150_v31, %v1108_v33 }
 0x157   : > { %1265 = vst [vmem:[%s261_s27] sm:$0xff] %v1559_v35  ;;  %v1153_v39 = vadd.f32 %v1152_v37, %v1110_v36 }
 0x159   : > { %v1561_v40 = vpack.c.bf16 %v1153_v39, %v1151_v38 }
 0x15b   : > { %1267 = vst [vmem:[%s261_s27 + $0x10] sm:$0xff] %v1561_v40 }
 0x18e   : > { %v1189_v41 = vpop.f32.mrf.mxu0 }
 0x18f   : > { %v1232_v42 = vpop.f32.mrf.mxu1  ;;  %v1190_v43 = vadd.f32 %v1189_v41, %v420_v18 }
 0x190   : > { %v1191_v44 = vpop.f32.mrf.mxu0 }
 0x191   : > { %v1234_v45 = vpop.f32.mrf.mxu1  ;;  %v1192_v46 = vadd.f32 %v1191_v44, %v424_v20  ;;  %v1233_v49 = vadd.f32 %v1232_v42, %v1190_v43 }
 0x192   : > { %v1193_v47 = vpop.f32.mrf.mxu0 }
 0x193   : > { %v1236_v48 = vpop.f32.mrf.mxu1  ;;  %v1235_v50 = vadd.f32 %v1234_v45, %v1192_v46  ;;  %v1194_v51 = vadd.f32 %v1193_v47, %v420_v18 }
 0x194   : > { %v1195_v52 = vpop.f32.mrf.mxu0 }
 0x195   : > { %v1560_v53 = vpack.c.bf16 %v1235_v50, %v1233_v49  ;;  %v1196_v54 = vadd.f32 %v1195_v52, %v424_v20  ;;  %v1238_v55 = vpop.f32.mrf.mxu1  ;;  %v1237_v56 = vadd.f32 %v1236_v48, %v1194_v51 }
 0x197   : > { %1266 = vst [vmem:[%s261_s27 + $0x8] sm:$0xff] %v1560_v53  ;;  %v1239_v57 = vadd.f32 %v1238_v55, %v1196_v54 }
 0x199   : > { %v1562_v58 = vpack.c.bf16 %v1239_v57, %v1237_v56 }
 0x19b   : > { %1268 = vst [vmem:[%s261_s27 + $0x18] sm:$0xff] %v1562_v58 }
 0x19c   : > { %1937 = shalt.err (!%p1934_p4)
}
 0x19d   : > { %s1938_s29 = scalar_lea.hbm %s2332_s8, 512  ;;  %s1942_s5 = scalar_lea.hbm %s2382_s3, 1536 }
 0x19e   : > { %p1939_p7 = scmp.ne.s32.totalorder %s2332_s8, %s1938_s29  ;;  %p1943_p9 = scmp.lt.s32.totalorder %s2332_s8, %s2382_s3 }
 0x19f   : > { %p1944_p10 = scmp.lt.s32.totalorder %s1942_s5, %s1938_s29 }
 0x1a0   : > { %p1940_p3 = pnand %p1939_p7, %p2395_p8 }
 0x1a1   : > { %p1945_p11 = por %p1944_p10, %p1943_p9 }
 0x1a2   : > { %p1941_p5 = pneg %p1940_p3 }
 0x1a4   : > { %p1946_p6 = pnand %p1945_p11, %p1941_p5 }
 0x1a6   : > { %1949 = shalt.err (!%p1946_p6)
}
 0x1a7   : > { %s2019_s27 = smov 256   ;;  %s2020_s19 = smov 768  }
 0x1a8   : > { %s2021_s6 = smov 16  }
 0x1a9   : > { %1572 = dma.vmem_to_hbm [thread:$0]  (%p2395_p8), %s2327_s10, 512, %s2332_s8, %s1270_s9, %s2019_s27, %s2020_s19, %s2021_s6  }
 0x1aa PF: > { %p1592_p13 = scmp.ge.s32.totalorder %s2008_s17, 2  ;;  %s1301_s4 = sand.u32 1, %s1988_s12  }
 0x1ab   : > { %p2396_p1 = scmp.ne.s32.totalorder %s2389_s26, 0  ;;  %s1302_s11 = scalar_lea.sflag [#allocation4], %s1301_s4 }
 0x1ad   : > { %p1586_p12 = pnand %p1592_p13, %p2396_p1 }
 0x1af   : > { %p1587_p0 = pneg %p1586_p12 }
 0x1b1   : > { %1983 = dma.done.wait (%p1587_p0), %s1302_s11, 512  }
 0x1b2   : > { %1985 = vsyncadd (%p1587_p0), %s1302_s11, 4294966784  ;;  %s20_s17 = sadd.s32 1, %s2008_s17   ;;  %s2397_s12 = smov %s1992_s13 }
 0x1b3   : > { %p17_p2 = scmp.ge.s32.totalorder %s20_s17, 5   ;;  %s2398_s13 = smov %s1996_s14 }
 0x1b4   : > { %s2399_s14 = smov %s2089_s24  ;;  %s2400_s15 = smov %s2004_s16 }
 0x1b5   : > { %s2401_s16 = smov %s2403_s18  ;;  %19 = sbr.rel (!%p17_p2) target bundleno = 7 (0x7), region = 94 }
 0x1ba   :  { %1307 = vsyncpa [#allocation3], 1 }
 0x1bb   :  { %1309 = vsyncpa [#allocation3 + $0x1], 1 }
 0x1bc   :  { %1310 = vsyncpa [#allocation6], 1 }
 0x1bd   :  { %1312 = vsyncpa [#allocation6 + $0x1], 1 }
 0x1be   :  { %1313 = vsyncpa [#allocation4], 1 }
 0x1bf   :  { %1315 = vsyncpa [#allocation4 + $0x1], 1 }

</bundles_post_ra>
